<compile_context>
chip_gen: v5e
topology: v5e:2x2
jax: 0.10.0
libtpu: 0.0.40
codegen_flags: <defaults>
</compile_context>

<pallas_src>
import functools
import math

import jax
import jax.numpy as jnp
from jax.experimental import pallas as pl
from jax.experimental.pallas import tpu as pltpu


# --------------------------- helpers ---------------------------

def _pick_tile(dim, pref):
    """Largest tile <= pref that evenly divides dim (falls back to full dim)."""
    if dim <= pref:
        return dim
    t = pref
    while t > 1 and dim % t:
        t //= 2
    return t if (t > 0 and dim % t == 0) else dim


# ---------------- fused linear (+bias, +activation) ----------------

def _linear_kernel(x_ref, w_ref, b_ref, o_ref, acc_ref, *, act):
    @pl.when(pl.program_id(2) == 0)
    def _():
        acc_ref[...] = jnp.zeros_like(acc_ref)

    acc_ref[...] += jnp.dot(x_ref[...], w_ref[...],
                            preferred_element_type=jnp.float32)

    @pl.when(pl.program_id(2) == pl.num_programs(2) - 1)
    def _():
        y = acc_ref[...] + b_ref[...].astype(jnp.float32)
        if act == "gelu":
            # TODO(synk): HF BERT uses exact erf-GELU; tanh approximation here.
            y = jax.nn.gelu(y, approximate=True)
        elif act == "tanh":
            y = jnp.tanh(y)
        o_ref[...] = y.astype(o_ref.dtype)


def pallas_linear(x, w, b, act=None, *, tm=256, tn=512, tk=512):
    M, K = x.shape
    N = w.shape[1]
    tm, tn, tk = _pick_tile(M, tm), _pick_tile(N, tn), _pick_tile(K, tk)
    grid = (M // tm, N // tn, K // tk)
    return pl.pallas_call(
        functools.partial(_linear_kernel, act=act),
        out_shape=jax.ShapeDtypeStruct((M, N), x.dtype),
        grid_spec=pltpu.PrefetchScalarGridSpec(
            num_scalar_prefetch=0,
            grid=grid,
            in_specs=[
                pl.BlockSpec((tm, tk), lambda i, j, k: (i, k)),
                pl.BlockSpec((tk, tn), lambda i, j, k: (k, j)),
                pl.BlockSpec((1, tn), lambda i, j, k: (0, j)),
            ],
            out_specs=pl.BlockSpec((tm, tn), lambda i, j, k: (i, j)),
            scratch_shapes=[pltpu.VMEM((tm, tn), jnp.float32)]),
        compiler_params=pltpu.CompilerParams(
            dimension_semantics=("parallel", "parallel", "arbitrary")),
        cost_estimate=pl.CostEstimate(
            flops=2 * M * N * K,
            transcendentals=M * N if act in ("gelu", "tanh") else 0,
            bytes_accessed=4 * (M * K + K * N + M * N)),
    )(x, w, b.reshape(1, N))


# -------- fused linear + bias + residual-add + layernorm epilogue --------

def _linear_res_ln_kernel(x_ref, w_ref, b_ref, r_ref, g_ref, bln_ref,
                          o_ref, acc_ref, *, eps):
    @pl.when(pl.program_id(1) == 0)
    def _():
        acc_ref[...] = jnp.zeros_like(acc_ref)

    acc_ref[...] += jnp.dot(x_ref[...], w_ref[...],
                            preferred_element_type=jnp.float32)

    @pl.when(pl.program_id(1) == pl.num_programs(1) - 1)
    def _():
        y = (acc_ref[...] + b_ref[...].astype(jnp.float32)
             + r_ref[...].astype(jnp.float32))
        mean = jnp.mean(y, axis=-1, keepdims=True)
        var = jnp.mean(jnp.square(y - mean), axis=-1, keepdims=True)
        yn = (y - mean) * jax.lax.rsqrt(var + eps)
        o_ref[...] = (yn * g_ref[...] + bln_ref[...]).astype(o_ref.dtype)


def pallas_linear_residual_layernorm(x, w, b, residual, g, bln,
                                     eps=1e-12, *, tm=256, tk=512):
    M, K = x.shape
    N = w.shape[1]
    tm, tk = _pick_tile(M, tm), _pick_tile(K, tk)
    grid = (M // tm, K // tk)
    return pl.pallas_call(
        functools.partial(_linear_res_ln_kernel, eps=eps),
        out_shape=jax.ShapeDtypeStruct((M, N), x.dtype),
        grid_spec=pltpu.PrefetchScalarGridSpec(
            num_scalar_prefetch=0,
            grid=grid,
            in_specs=[
                pl.BlockSpec((tm, tk), lambda i, k: (i, k)),
                pl.BlockSpec((tk, N), lambda i, k: (k, 0)),
                pl.BlockSpec((1, N), lambda i, k: (0, 0)),
                pl.BlockSpec((tm, N), lambda i, k: (i, 0)),
                pl.BlockSpec((1, N), lambda i, k: (0, 0)),
                pl.BlockSpec((1, N), lambda i, k: (0, 0)),
            ],
            out_specs=pl.BlockSpec((tm, N), lambda i, k: (i, 0)),
            scratch_shapes=[pltpu.VMEM((tm, N), jnp.float32)]),
        compiler_params=pltpu.CompilerParams(
            dimension_semantics=("parallel", "arbitrary")),
        cost_estimate=pl.CostEstimate(
            flops=2 * M * N * K + 10 * M * N,
            transcendentals=M,
            bytes_accessed=4 * (M * K + K * N + 2 * M * N)),
    )(x, w, b.reshape(1, N), residual, g.reshape(1, N), bln.reshape(1, N))


# --------------------------- layernorm ---------------------------

def _layernorm_kernel(x_ref, g_ref, b_ref, o_ref, *, eps):
    x = x_ref[...].astype(jnp.float32)
    mean = jnp.mean(x, axis=-1, keepdims=True)
    var = jnp.mean(jnp.square(x - mean), axis=-1, keepdims=True)
    y = (x - mean) * jax.lax.rsqrt(var + eps)
    o_ref[...] = (y * g_ref[...] + b_ref[...]).astype(o_ref.dtype)


def pallas_layernorm(x, g, b, eps=1e-12, *, tm=512):
    M, H = x.shape
    tm = _pick_tile(M, tm)
    return pl.pallas_call(
        functools.partial(_layernorm_kernel, eps=eps),
        out_shape=jax.ShapeDtypeStruct((M, H), x.dtype),
        grid_spec=pltpu.PrefetchScalarGridSpec(
            num_scalar_prefetch=0,
            grid=(M // tm,),
            in_specs=[pl.BlockSpec((tm, H), lambda i: (i, 0)),
                      pl.BlockSpec((1, H), lambda i: (0, 0)),
                      pl.BlockSpec((1, H), lambda i: (0, 0))],
            out_specs=pl.BlockSpec((tm, H), lambda i: (i, 0))),
        compiler_params=pltpu.CompilerParams(
            dimension_semantics=("parallel",)),
    )(x, g.reshape(1, H), b.reshape(1, H))


# ----------------- multi-head self-attention (fused QKV) -----------------

def _attention_kernel(mask_ref, qkv_ref, o_ref, *, num_heads, head_dim, scale):
    H = num_heads * head_dim
    mask = mask_ref[0]                       # (1, S) additive, broadcast over q rows
    heads = []
    # TODO(synk): full (S,S) scores per head; switch to flash-style online
    # softmax over KV tiles for long sequences.
    for h in range(num_heads):
        q = qkv_ref[0, :, h * head_dim:(h + 1) * head_dim].astype(jnp.float32) * scale
        k = qkv_ref[0, :, H + h * head_dim:H + (h + 1) * head_dim].astype(jnp.float32)
        v = qkv_ref[0, :, 2 * H + h * head_dim:2 * H + (h + 1) * head_dim].astype(jnp.float32)
        s = jnp.dot(q, k.T, preferred_element_type=jnp.float32) + mask
        m = jnp.max(s, axis=-1, keepdims=True)
        p = jnp.exp(s - m)
        l = jnp.sum(p, axis=-1, keepdims=True)
        ctx = jnp.dot(p, v, preferred_element_type=jnp.float32)
        heads.append(ctx * pl.reciprocal(l, approx=True))
    # single lane-dense (S, H) store
    o_ref[0] = jnp.concatenate(heads, axis=-1).astype(o_ref.dtype)


def pallas_attention(qkv, ext_mask, num_heads, head_dim):
    B, S, threeH = qkv.shape
    H = threeH // 3
    scale = 1.0 / math.sqrt(head_dim)
    return pl.pallas_call(
        functools.partial(_attention_kernel, num_heads=num_heads,
                          head_dim=head_dim, scale=scale),
        out_shape=jax.ShapeDtypeStruct((B, S, H), qkv.dtype),
        grid_spec=pltpu.PrefetchScalarGridSpec(
            num_scalar_prefetch=0,
            grid=(B,),
            in_specs=[pl.BlockSpec((1, 1, S), lambda b: (b, 0, 0)),
                      pl.BlockSpec((1, S, threeH), lambda b: (b, 0, 0))],
            out_specs=pl.BlockSpec((1, S, H), lambda b: (b, 0, 0))),
        compiler_params=pltpu.CompilerParams(
            dimension_semantics=("parallel",)),
        cost_estimate=pl.CostEstimate(
            flops=4 * B * num_heads * S * S * head_dim,
            transcendentals=B * num_heads * S * S,
            bytes_accessed=4 * (B * S * threeH + B * S + B * S * H)),
    )(ext_mask, qkv)


# --------------------------- pooling ---------------------------
# TODO(synk): could be fused into the last layer's layernorm epilogue to avoid
# re-reading two full hidden-state tensors at large (B, S, H).

def _first_last_avg_kernel(f_ref, l_ref, o_ref):
    f = jnp.mean(f_ref[...].astype(jnp.float32), axis=1)
    l = jnp.mean(l_ref[...].astype(jnp.float32), axis=1)
    o_ref[...] = (0.5 * (f + l)).astype(o_ref.dtype)


def pallas_first_last_avg(first, last):
    B, _, H = first.shape
    return pl.pallas_call(
        _first_last_avg_kernel,
        out_shape=jax.ShapeDtypeStruct((B, H), first.dtype),
    )(first, last)


def _seq_avg_kernel(x_ref, o_ref):
    o_ref[...] = jnp.mean(x_ref[...].astype(jnp.float32), axis=1).astype(o_ref.dtype)


def pallas_seq_avg(x):
    B, _, H = x.shape
    return pl.pallas_call(
        _seq_avg_kernel,
        out_shape=jax.ShapeDtypeStruct((B, H), x.dtype),
    )(x)


# ------------------------- Tiny BERT model -------------------------

CFG = dict(
    vocab_size=128,
    hidden=32,
    num_layers=2,
    num_heads=2,
    intermediate=64,
    max_position=16,
    type_vocab=2,
)


def init_params(key, cfg):
    H, I = cfg["hidden"], cfg["intermediate"]

    def dense(k, fan_in, fan_out):
        w = 0.02 * jax.random.normal(k, (fan_in, fan_out), jnp.float32)
        b = jnp.zeros((fan_out,), jnp.float32)
        return w, b

    keys = iter(jax.random.split(key, 64))
    params = {
        "word_emb": 0.02 * jax.random.normal(next(keys), (cfg["vocab_size"], H), jnp.float32),
        "pos_emb": 0.02 * jax.random.normal(next(keys), (cfg["max_position"], H), jnp.float32),
        "type_emb": 0.02 * jax.random.normal(next(keys), (cfg["type_vocab"], H), jnp.float32),
        "emb_ln_g": jnp.ones((H,), jnp.float32),
        "emb_ln_b": jnp.zeros((H,), jnp.float32),
        "layers": [],
    }
    for _ in range(cfg["num_layers"]):
        wq, bq = dense(next(keys), H, H)
        wk, bk = dense(next(keys), H, H)
        wv, bv = dense(next(keys), H, H)
        wo, bo = dense(next(keys), H, H)
        w1, b1 = dense(next(keys), H, I)
        w2, b2 = dense(next(keys), I, H)
        params["layers"].append(dict(
            # fused QKV weight: (H, 3H), columns ordered [q | k | v]
            wqkv=jnp.concatenate([wq, wk, wv], axis=1),
            bqkv=jnp.concatenate([bq, bk, bv], axis=0),
            wo=wo, bo=bo, w1=w1, b1=b1, w2=w2, b2=b2,
            ln1_g=jnp.ones((H,), jnp.float32), ln1_b=jnp.zeros((H,), jnp.float32),
            ln2_g=jnp.ones((H,), jnp.float32), ln2_b=jnp.zeros((H,), jnp.float32),
        ))
    wp, bp = dense(next(keys), H, H)
    params["pooler_w"], params["pooler_b"] = wp, bp
    return params


def bert_layer(x, p, ext_mask, num_heads):
    B, S, H = x.shape
    D = H // num_heads
    x2 = x.reshape(B * S, H)

    # fused QKV projection: one MXU pass, one read of x2
    qkv = pallas_linear(x2, p["wqkv"], p["bqkv"])                     # (B*S, 3H)
    ctx = pallas_attention(qkv.reshape(B, S, 3 * H), ext_mask, num_heads, D)
    ctx = ctx.reshape(B * S, H)

    # attention output projection fused with bias + residual + layernorm
    x2 = pallas_linear_residual_layernorm(ctx, p["wo"], p["bo"], x2,
                                          p["ln1_g"], p["ln1_b"])

    # FFN: linear+gelu, then linear fused with bias + residual + layernorm
    h = pallas_linear(x2, p["w1"], p["b1"], act="gelu")
    x2 = pallas_linear_residual_layernorm(h, p["w2"], p["b2"], x2,
                                          p["ln2_g"], p["ln2_b"])
    return x2.reshape(B, S, H)


def model_forward(params, input_ids, attention_mask, token_type_ids,
                  encoder_type="fist-last-avg", cfg=CFG):
    B, S = input_ids.shape
    H, nh = cfg["hidden"], cfg["num_heads"]

    # embeddings (gathers are glue; layernorm done in Pallas)
    emb = (params["word_emb"][input_ids]
           + params["pos_emb"][jnp.arange(S)][None, :, :]
           + params["type_emb"][token_type_ids])
    x = pallas_layernorm(emb.reshape(B * S, H),
                         params["emb_ln_g"], params["emb_ln_b"]).reshape(B, S, H)

    # thin additive mask (B, 1, S); broadcast over query rows inside the kernel
    ext_mask = ((1.0 - attention_mask.astype(jnp.float32)) * -10000.0).reshape(B, 1, S)

    hidden_states = [x]
    for layer_params in params["layers"]:
        x = bert_layer(x, layer_params, ext_mask, nh)
        hidden_states.append(x)

    if encoder_type == "fist-last-avg":
        first = hidden_states[1]        # output of first encoder layer (HF indexing)
        last = hidden_states[-1]        # output of last encoder layer
        return pallas_first_last_avg(first, last)
    if encoder_type == "last-avg":
        return pallas_seq_avg(hidden_states[-1])
    if encoder_type == "cls":
        return hidden_states[-1][:, 0]
    if encoder_type == "pooler":
        cls = hidden_states[-1][:, 0]
        return pallas_linear(cls, params["pooler_w"], params["pooler_b"], act="tanh")
    raise ValueError(encoder_type)


if __name__ == "__main__":
    key = jax.random.PRNGKey(0)
    pkey, ikey = jax.random.split(key)

    params = init_params(pkey, CFG)

    B, S = 2, 8
    input_ids = jax.random.randint(ikey, (B, S), 0, CFG["vocab_size"], dtype=jnp.int32)
    attention_mask = jnp.ones((B, S), dtype=jnp.int32)
    token_type_ids = jnp.zeros((B, S), dtype=jnp.int32)

    out = model_forward(params, input_ids, attention_mask, token_type_ids,
                        encoder_type="fist-last-avg")
    out = jax.block_until_ready(out)
    assert out.shape == (B, CFG["hidden"])
    print("KERNEL_OK")
</pallas_src>

<mosaic_0001>
module attributes {stable_mosaic.version = 11 : i64} {
  func.func @_layernorm_kernel(%arg0: i32, %arg1: memref<16x32xf32, #tpu.memory_space<vmem>>, %arg2: memref<1x32xf32, #tpu.memory_space<vmem>>, %arg3: memref<1x32xf32, #tpu.memory_space<vmem>>, %arg4: memref<16x32xf32, #tpu.memory_space<vmem>>) attributes {dimension_semantics = [#tpu.dimension_semantics<parallel>], iteration_bounds = array<i64: 1>, scalar_prefetch = 0 : i64, scratch_operands = 0 : i64, tpu.core_type = #tpu.core_type<tc>, window_params = [{transform_indices = @transform_0, window_bounds = array<i64: 16, 32>}, {pipeline_mode = #tpu.pipeline_mode<synchronous>, transform_indices = @transform_1, window_bounds = array<i64: 1, 32>}, {pipeline_mode = #tpu.pipeline_mode<synchronous>, transform_indices = @transform_2, window_bounds = array<i64: 1, 32>}, {transform_indices = @transform_3, window_bounds = array<i64: 16, 32>}]} {
    %c0 = arith.constant 0 : index
    %c0_0 = arith.constant 0 : index
    %0 = vector.load %arg1[%c0, %c0_0] : memref<16x32xf32, #tpu.memory_space<vmem>>, vector<16x32xf32>
    %cst = arith.constant dense<0.000000e+00> : vector<16xf32>
    %1 = vector.multi_reduction <add>, %0, %cst [1] : vector<16x32xf32> to vector<16xf32>
    %2 = vector.shape_cast %1 : vector<16xf32> to vector<16x1xf32>
    %cst_1 = arith.constant 3.200000e+01 : f32
    %3 = vector.broadcast %cst_1 : f32 to vector<16x1xf32>
    %4 = arith.divf %2, %3 : vector<16x1xf32>
    %5 = vector.broadcast %4 : vector<16x1xf32> to vector<16x32xf32>
    %6 = arith.subf %0, %5 : vector<16x32xf32>
    %7 = arith.mulf %6, %6 : vector<16x32xf32>
    %cst_2 = arith.constant dense<0.000000e+00> : vector<16xf32>
    %8 = vector.multi_reduction <add>, %7, %cst_2 [1] : vector<16x32xf32> to vector<16xf32>
    %9 = vector.shape_cast %8 : vector<16xf32> to vector<16x1xf32>
    %cst_3 = arith.constant 3.200000e+01 : f32
    %10 = vector.broadcast %cst_3 : f32 to vector<16x1xf32>
    %11 = arith.divf %9, %10 : vector<16x1xf32>
    %12 = vector.broadcast %4 : vector<16x1xf32> to vector<16x32xf32>
    %13 = arith.subf %0, %12 : vector<16x32xf32>
    %cst_4 = arith.constant 9.99999996E-13 : f32
    %14 = vector.broadcast %cst_4 : f32 to vector<16x1xf32>
    %15 = arith.addf %11, %14 : vector<16x1xf32>
    %16 = math.rsqrt %15 : vector<16x1xf32>
    %17 = vector.broadcast %16 : vector<16x1xf32> to vector<16x32xf32>
    %18 = arith.mulf %13, %17 : vector<16x32xf32>
    %c0_5 = arith.constant 0 : index
    %c0_6 = arith.constant 0 : index
    %19 = vector.load %arg2[%c0_5, %c0_6] : memref<1x32xf32, #tpu.memory_space<vmem>>, vector<1x32xf32>
    %20 = vector.broadcast %19 : vector<1x32xf32> to vector<16x32xf32>
    %21 = arith.mulf %18, %20 : vector<16x32xf32>
    %c0_7 = arith.constant 0 : index
    %c0_8 = arith.constant 0 : index
    %22 = vector.load %arg3[%c0_7, %c0_8] : memref<1x32xf32, #tpu.memory_space<vmem>>, vector<1x32xf32>
    %23 = vector.broadcast %22 : vector<1x32xf32> to vector<16x32xf32>
    %24 = arith.addf %21, %23 : vector<16x32xf32>
    %c0_9 = arith.constant 0 : index
    %c0_10 = arith.constant 0 : index
    %25 = vector.load %arg4[%c0_9, %c0_10] : memref<16x32xf32, #tpu.memory_space<vmem>>, vector<16x32xf32>
    tpu.vector_store %arg4[%c0_9, %c0_10], %24 {strides = array<i32>} : memref<16x32xf32, #tpu.memory_space<vmem>>, vector<16x32xf32>,
    return
  }
  func.func @transform_0(%arg0: i32) -> (i32, i32) {
    %c0_i32 = arith.constant 0 : i32
    %c0_i32_0 = arith.constant 0 : i32
    return %arg0, %c0_i32 : i32, i32
  }
  func.func @transform_1(%arg0: i32) -> (i32, i32) {
    %c0_i32 = arith.constant 0 : i32
    %c0_i32_0 = arith.constant 0 : i32
    %c0_i32_1 = arith.constant 0 : i32
    return %c0_i32, %c0_i32_0 : i32, i32
  }
  func.func @transform_2(%arg0: i32) -> (i32, i32) {
    %c0_i32 = arith.constant 0 : i32
    %c0_i32_0 = arith.constant 0 : i32
    %c0_i32_1 = arith.constant 0 : i32
    return %c0_i32, %c0_i32_0 : i32, i32
  }
  func.func @transform_3(%arg0: i32) -> (i32, i32) {
    %c0_i32 = arith.constant 0 : i32
    %c0_i32_0 = arith.constant 0 : i32
    return %arg0, %c0_i32 : i32, i32
  }
}

</mosaic_0001>

<bundles_post_ra>
// kernel: tpu_custom_call.1
= control target key start
LH: loop header
LB: loop body
LE: loop exit
PB: predicated region body
PF: predicated region fallthrough
CT: control target
= control target key end

     0   :  { %8 = vsyncpa [#allocation3], 0  ;;  %s275_s0 = inlined_call_operand.hbm [shape: f32[16,32], index: 0, kind: input, shape index: {}]   ;;  %s276_s1 = inlined_call_operand.hbm [shape: f32[1,32], index: 1, kind: input, shape index: {}]   ;;  %s277_s2 = inlined_call_operand.vmem [shape: f32[1,32], index: 2, kind: input, shape index: {}]   ;;  %s278_s3 = inlined_call_operand.hbm [shape: f32[16,32], index: 3, kind: output, shape index: {}]  }
   0x1   :  { %9 = vsyncpa [#allocation6], 0 }
   0x2   :  { %10 = vsyncpa [#allocation4], 0  ;;  %s15_s14 = sshll.u32 %s275_s0, 4  ;;  %s225_s15 = smov [#allocation2]   ;;  %s16_s14 = int_to_ptr.hbm [resolvable:$true] %s15_s14 }
   0x3   :  { %s17_s16 = sshll.u32 %s225_s15, 4  ;;  %s29_s19 = sshll.u32 %s276_s1, 4  ;;  %s18_s16 = int_to_ptr.vmem [resolvable:$true] %s17_s16  ;;  %s30_s19 = int_to_ptr.hbm [resolvable:$true] %s29_s19 }
   0x4   :  { %s226_s20 = smov 128   ;;  %s227_s21 = smov 8  }
   0x5   :  { %23 = dma.hbm_to_vmem [thread:$0]  %s16_s14, 256, %s18_s16, [#allocation3], %s226_s20, %s226_s20, %s227_s21  }
   0x6   :  { %s228_s22 = smov [#allocation5]  }
   0x7   :  { %s31_s23 = sshll.u32 %s228_s22, 4  ;;  %s32_s23 = int_to_ptr.vmem [resolvable:$true] %s31_s23 }
   0x8   :  { %34 = dma.hbm_to_vmem [thread:$0]  %s30_s19, 16, %s32_s23, [#allocation6]  }
   0x9   :  { %219 = dma.done.wait [#allocation3], 256  }
   0xa   :  { %220 = vsyncadd [#allocation3], 4294967040 }
   0xb   :  { %221 = dma.done.wait [#allocation6], 16  }
   0xc   :  { %222 = vsyncadd [#allocation6], 4294967280  ;;  %vm47_vm0 = vcmask 261120   ;;  %v45_v0 = vld [vmem:[#allocation2] sm:$0xff]  ;;  %v46_v2 = vld [vmem:[#allocation2 + $0x8] sm:$0xff]  ;;  %v229_v4 = vmov 32.0  }
   0xd   :  { %v48_v1 = vsel %vm47_vm0, %v45_v0, 0.0  ;;  %v51_v3 = vsel %vm47_vm0, %v46_v2, 0.0  ;;  %141 = vrcp.f32 %v229_v4  ;;  %v139_v35 = vld [vmem:[#allocation5] ss:$0 sm:$0xff]  ;;  %v140_v39 = vld [vmem:[%s277_s2] ss:$0 sm:$0xff] }
   0xe   :  { %49 = vadd.xlane.f32.xlu0 %v48_v1  ;;  %s230_s24 = smov [#allocation7]   ;;  %s119_s28 = sshll.u32 %s278_s3, 4  ;;  %s120_s28 = int_to_ptr.hbm [resolvable:$true] %s119_s28 }
   0xf   :  { %s117_s25 = sshll.u32 %s230_s24, 4  ;;  %s118_s25 = int_to_ptr.vmem [resolvable:$true] %s117_s25 }
  0x13   :  { %v142_v5 = vpop.eup %141 }
  0x14   :  { %v55_v6 = vmul.f32 32.0, %v142_v5  ;;  %vm59_vm1 = vweird.f32 %v142_v5 }
  0x16   :  { %52 = vadd.xlane.f32.xlu0 %v51_v3  ;;  %v56_v7 = vsub.f32 1.0, %v55_v6 }
  0x18   :  { %v57_v8 = vmul.f32 %v142_v5, %v56_v7 }
  0x1a   :  { %v58_v9 = vadd.f32 %v142_v5, %v57_v8 }
  0x1c   :  { %v60_v10 = vsel %vm59_vm1, %v142_v5, %v58_v9 }
  0x81   :  { %v50_v11 = vpop.xlane.xlu0 %49 }
  0x82   :  { %v61_v12 = vmul.f32 %v60_v10, %v50_v11 }
  0x84   :  { %v63_v13 = vsub.f32 %v45_v0, %v61_v12 }
  0x86   :  { %v65_v14 = vmul.f32 %v63_v13, %v63_v13 }
  0x88   :  { %v67_v15 = vsel %vm47_vm0, %v65_v14, 0.0 }
  0x89   :  { %68 = vadd.xlane.f32.xlu1 %v67_v15  ;;  %v53_v16 = vpop.xlane.xlu0 %52 }
  0x8a   :  { %v62_v17 = vmul.f32 %v60_v10, %v53_v16 }
  0x8c   :  { %v64_v18 = vsub.f32 %v46_v2, %v62_v17 }
  0x8e   :  { %v66_v19 = vmul.f32 %v64_v18, %v64_v18 }
  0x90   :  { %v70_v20 = vsel %vm47_vm0, %v66_v19, 0.0 }
  0x91   :  { %71 = vadd.xlane.f32.xlu1 %v70_v20 }
  0xfc   :  { %v69_v21 = vpop.xlane.xlu1 %68 }
  0xfd   :  { %v73_v22 = vmul.f32 %v69_v21, %v60_v10 }
  0xff   :  { %v75_v23 = vadd.f32 1e-12, %v73_v22 }
 0x101   :  { %143 = vrsqrt.f32 %v75_v23  ;;  %vm83_vm3 = vweird.f32 %v75_v23 }
 0x104   :  { %v72_v24 = vpop.xlane.xlu1 %71 }
 0x105   :  { %v74_v25 = vmul.f32 %v72_v24, %v60_v10 }
 0x107   :  { %v144_v26 = vpop.eup %143  ;;  %v76_v27 = vadd.f32 1e-12, %v74_v25 }
 0x108   :  { %v78_v28 = vmul.f32 %v144_v26, %v75_v23  ;;  %vm84_vm2 = vweird.f32 %v144_v26 }
 0x109   :  { %145 = vrsqrt.f32 %v76_v27  ;;  %vm85_vm4 = vmor %vm83_vm3, %vm84_vm2  ;;  %vm93_vm6 = vweird.f32 %v76_v27 }
 0x10a   :  { %v79_v29 = vmul.f32 %v144_v26, %v78_v28 }
 0x10c   :  { %v80_v30 = vmul.f32 0.5, %v79_v29 }
 0x10e   :  { %v81_v31 = vsub.f32 1.5, %v80_v30 }
 0x10f   :  { %v146_v32 = vpop.eup %145 }
 0x110   :  { %v82_v33 = vmul.f32 %v144_v26, %v81_v31  ;;  %v88_v34 = vmul.f32 %v146_v32, %v76_v27  ;;  %vm94_vm5 = vweird.f32 %v146_v32 }
 0x111   :  { %vm95_vm7 = vmor %vm93_vm6, %vm94_vm5 }
 0x112   :  { %v86_v36 = vsel %vm85_vm4, %v144_v26, %v82_v33  ;;  %v89_v37 = vmul.f32 %v146_v32, %v88_v34 }
 0x113   :  { %v97_v38 = vmul.f32 %v86_v36, %v63_v13 }
 0x114   :  { %v90_v40 = vmul.f32 0.5, %v89_v37 }
 0x115   :  { %v103_v41 = vmul.f32 %v139_v35, %v97_v38 }
 0x116   :  { %v91_v42 = vsub.f32 1.5, %v90_v40 }
 0x117   :  { %v109_v43 = vadd.f32 %v140_v39, %v103_v41 }
 0x118   :  { %v92_v44 = vmul.f32 %v146_v32, %v91_v42 }
 0x119   :  { %111 = vst.msk [vmem:[#allocation7] sm:$0xff] %vm47_vm0, %v109_v43 }
 0x11a   :  { %v96_v45 = vsel %vm95_vm7, %v146_v32, %v92_v44 }
 0x11b   :  { %v98_v46 = vmul.f32 %v96_v45, %v64_v18 }
 0x11d   :  { %v104_v47 = vmul.f32 %v139_v35, %v98_v46 }
 0x11f   :  { %v110_v48 = vadd.f32 %v140_v39, %v104_v47 }
 0x121   :  { %112 = vst.msk [vmem:[#allocation7 + $0x8] sm:$0xff] %vm47_vm0, %v110_v48 }
 0x122   :  { %125 = dma.vmem_to_hbm [thread:$0]  %s118_s25, 256, %s120_s28, [#allocation4], %s226_s20, %s226_s20, %s227_s21  }
 0x123   :  { %223 = dma.done.wait [#allocation4], 256  }
 0x124   :  { %224 = vsyncadd [#allocation4], 4294967040 }
 0x125   :  { %130 = vsyncpa [#allocation3], 1 }
 0x126   :  { %131 = vsyncpa [#allocation6], 1 }
 0x127   :  { %132 = vsyncpa [#allocation4], 1 }

</bundles_post_ra>
